<compile_context>
chip_gen: v5e
topology: v5e:2x2
jax: 0.10.0
libtpu: 0.0.40
codegen_flags: <defaults>
</compile_context>

<pallas_src>
import jax
import jax.numpy as jnp
from jax.experimental import pallas as pl
from jax.experimental.pallas import tpu as pltpu

EPSILON = 1e-8


def bahdanau_kernel(dec_ref, enc_ref, wwt_ref, wb_ref, uwt_ref, ub_ref,
                    vw_ref, vb_ref, c_ref, a_ref):
    # dec_ref: (TB, H)   enc_ref: (TB, T, H)   weights pre-transposed.
    dec = dec_ref[...].astype(jnp.float32)

    # (TB, T, H) -> (T, TB, H): per-batch terms now broadcast over the leading
    # time axis and all time reductions are leading-axis reductions.
    enc_t = pltpu.einshape("bth->tbh", enc_ref[...].astype(jnp.float32))
    T, TB, H = enc_t.shape

    # w = W(dec_h_prev): (TB, H) @ (H, H) on the MXU.
    w = jnp.dot(dec, wwt_ref[...], preferred_element_type=jnp.float32) + wb_ref[...]

    # u = U(enc_h_all): one (T*TB, H) @ (H, H) MXU matmul.  TB % 8 == 0, so the
    # leading-dim merge/split reshapes are layout no-ops.
    u = jnp.dot(enc_t.reshape(T * TB, H), uwt_ref[...],
                preferred_element_type=jnp.float32)
    u = (u + ub_ref[...]).reshape(T, TB, H)

    # s = v(tanh(w + u)): tanh on the EUP; the v projection is an elementwise
    # multiply + lane reduce (no N=1 MXU matmul).
    z = jnp.tanh(u + w)                                                  # (T, TB, H)
    s = jnp.sum(z * vw_ref[...], axis=-1, keepdims=True) + vb_ref[...]   # (T, TB, 1)

    # Softmax over time (leading axis) with the reference's explicit epsilon.
    # Normalize via one reciprocal per row + multiply instead of T divides.
    m = jnp.max(s, axis=0, keepdims=True)                                # (1, TB, 1)
    e = jnp.exp(s - m)                                                   # (T, TB, 1)
    denom = jnp.sum(e, axis=0, keepdims=True) + EPSILON                  # (1, TB, 1)
    a = e * (1.0 / denom)                                                # (T, TB, 1)

    # c = sum_t a[t, b] * enc[t, b, :]: VPU multiply + leading-axis reduce
    # (no M=1 matmul, no transpose of a).
    c = jnp.sum(enc_t * a, axis=0)                                       # (TB, H)

    c_ref[...] = c.astype(c_ref.dtype)
    a_ref[...] = a.astype(a_ref.dtype)


def _pick_batch_tile(B, T, H, max_block_b):
    """Largest multiple-of-8 batch tile that fits a conservative VMEM budget."""
    budget = 24 * 1024 * 1024                 # stay under default 32 MiB scoped VMEM
    fixed = 2 * (2 * H * H * 4)               # two (H, H) f32 weights, double-buffered
    # enc tile (double buffer) + in-kernel f32 temporaries (enc_t, u, z, ...)
    # + dec/c rows, all per batch row.
    per_row = (T * H * 4) * 6 + (H * 4) * 6 + (T * 4) * 4
    tb = min(max_block_b, ((B + 7) // 8) * 8)
    tb = max(8, (tb // 8) * 8)
    while tb > 8 and fixed + tb * per_row > budget:
        tb -= 8
    return tb


def bahdanau_attention(dec_h_prev, enc_h_all, params, *, max_block_b=128):
    B, H = dec_h_prev.shape
    _, T, _ = enc_h_all.shape
    Ww, Wb, Uw, Ub, vw, vb = params

    # Pre-transpose / reshape parameters once in the wrapper (trace-time cost
    # only) so the kernel does zero per-step cross-lane work on weights.
    WwT = jnp.asarray(Ww, jnp.float32).T            # (H, H)
    UwT = jnp.asarray(Uw, jnp.float32).T            # (H, H)
    Wb2 = jnp.asarray(Wb, jnp.float32).reshape(1, H)
    Ub2 = jnp.asarray(Ub, jnp.float32).reshape(1, H)
    vw2 = jnp.asarray(vw, jnp.float32).reshape(1, H)
    vb2 = jnp.asarray(vb, jnp.float32).reshape(1, 1)

    # Batch tile: multiple of 8 (sublane) so in-kernel leading-dim reshapes are
    # layout no-ops; as large as the VMEM budget allows to amortize per-step
    # overhead and fill MXU rows.
    TB = _pick_batch_tile(B, T, H, max_block_b)
    B_pad = pl.cdiv(B, TB) * TB
    if B_pad != B:
        pad = B_pad - B
        dec_h_prev = jnp.pad(dec_h_prev, ((0, pad), (0, 0)))
        enc_h_all = jnp.pad(enc_h_all, ((0, pad), (0, 0), (0, 0)))

    const = lambda shape: pl.BlockSpec(shape, lambda b: (0,) * len(shape))

    grid_spec = pltpu.PrefetchScalarGridSpec(
        num_scalar_prefetch=0,
        grid=(B_pad // TB,),
        in_specs=[
            pl.BlockSpec((TB, H), lambda b: (b, 0)),        # dec_h_prev
            pl.BlockSpec((TB, T, H), lambda b: (b, 0, 0)),  # enc_h_all
            const((H, H)),   # Ww.T  (VMEM-resident across grid steps)
            const((1, H)),   # Wb
            const((H, H)),   # Uw.T
            const((1, H)),   # Ub
            const((1, H)),   # vw
            const((1, 1)),   # vb
        ],
        out_specs=[
            pl.BlockSpec((TB, H), lambda b: (b, 0)),        # c
            pl.BlockSpec((T, TB, 1), lambda b: (0, b, 0)),  # a (time-major)
        ],
    )

    c, a_tm = pl.pallas_call(
        bahdanau_kernel,
        out_shape=(
            jax.ShapeDtypeStruct((B_pad, H), dec_h_prev.dtype),
            jax.ShapeDtypeStruct((T, B_pad, 1), jnp.float32),
        ),
        grid_spec=grid_spec,
        compiler_params=pltpu.CompilerParams(
            dimension_semantics=("parallel",)),
    )(dec_h_prev, enc_h_all, WwT, Wb2, UwT, Ub2, vw2, vb2)

    # Back to the module's output layout: c (B, H), a (B, T, 1).  The a tensor
    # is tiny (B*T floats), so this wrapper transpose is negligible.
    a = jnp.transpose(a_tm, (1, 0, 2))[:B]
    return c[:B], a


def reference(dec_h_prev, enc_h_all, params):
    Ww, Wb, Uw, Ub, vw, vb = params
    w = (dec_h_prev @ Ww.T + Wb)[:, None, :]        # (B, 1, H)
    u = enc_h_all @ Uw.T + Ub                       # (B, T, H)
    s = jnp.tanh(w + u) @ vw.T + vb                 # (B, T, 1)
    m = jnp.max(s, axis=1, keepdims=True)
    e = jnp.exp(s - m)
    a = e / (jnp.sum(e, axis=1, keepdims=True) + EPSILON)
    c = jnp.sum(enc_h_all * a, axis=1)
    return c, a


if __name__ == "__main__":
    key = jax.random.PRNGKey(0)
    # Small but hardware-aligned demo shapes: sublane multiple (8), lane (128).
    B, T, H = 8, 8, 128

    keys = jax.random.split(key, 8)
    dec_h_prev = jax.random.normal(keys[0], (B, H), jnp.float32)
    enc_h_all = jax.random.normal(keys[1], (B, T, H), jnp.float32)

    # nn.Linear-shaped parameters: weight (out, in), bias (out,).
    scale = 1.0 / jnp.sqrt(H)
    Ww = jax.random.uniform(keys[2], (H, H), jnp.float32, -scale, scale)
    Wb = jax.random.uniform(keys[3], (H,), jnp.float32, -scale, scale)
    Uw = jax.random.uniform(keys[4], (H, H), jnp.float32, -scale, scale)
    Ub = jax.random.uniform(keys[5], (H,), jnp.float32, -scale, scale)
    vw = jax.random.uniform(keys[6], (1, H), jnp.float32, -scale, scale)
    vb = jax.random.uniform(keys[7], (1,), jnp.float32, -scale, scale)
    params = (Ww, Wb, Uw, Ub, vw, vb)

    c, a = bahdanau_attention(dec_h_prev, enc_h_all, params)
    jax.block_until_ready((c, a))

    with jax.default_matmul_precision("float32"):
        c_ref, a_ref = reference(dec_h_prev, enc_h_all, params)

    assert c.shape == (B, H) and a.shape == (B, T, 1)
    assert jnp.allclose(c, c_ref, atol=2e-5, rtol=2e-5)
    assert jnp.allclose(a, a_ref, atol=2e-5, rtol=2e-5)

    print("KERNEL_OK")
</pallas_src>

<mosaic_0001>
module attributes {stable_mosaic.version = 11 : i64} {
  func.func @bahdanau_kernel(%arg0: i32, %arg1: memref<8x128xf32, #tpu.memory_space<vmem>>, %arg2: memref<8x8x128xf32, #tpu.memory_space<vmem>>, %arg3: memref<128x128xf32, #tpu.memory_space<vmem>>, %arg4: memref<1x128xf32, #tpu.memory_space<vmem>>, %arg5: memref<128x128xf32, #tpu.memory_space<vmem>>, %arg6: memref<1x128xf32, #tpu.memory_space<vmem>>, %arg7: memref<1x128xf32, #tpu.memory_space<vmem>>, %arg8: memref<1x1xf32, #tpu.memory_space<vmem>>, %arg9: memref<8x128xf32, #tpu.memory_space<vmem>>, %arg10: memref<8x8x1xf32, #tpu.memory_space<vmem>>) attributes {dimension_semantics = [#tpu.dimension_semantics<parallel>], iteration_bounds = array<i64: 1>, scalar_prefetch = 0 : i64, scratch_operands = 0 : i64, tpu.core_type = #tpu.core_type<tc>, window_params = [{transform_indices = @transform_0, window_bounds = array<i64: 8, 128>}, {transform_indices = @transform_1, window_bounds = array<i64: 8, 8, 128>}, {pipeline_mode = #tpu.pipeline_mode<synchronous>, transform_indices = @transform_2, window_bounds = array<i64: 128, 128>}, {pipeline_mode = #tpu.pipeline_mode<synchronous>, transform_indices = @transform_3, window_bounds = array<i64: 1, 128>}, {pipeline_mode = #tpu.pipeline_mode<synchronous>, transform_indices = @transform_4, window_bounds = array<i64: 128, 128>}, {pipeline_mode = #tpu.pipeline_mode<synchronous>, transform_indices = @transform_5, window_bounds = array<i64: 1, 128>}, {pipeline_mode = #tpu.pipeline_mode<synchronous>, transform_indices = @transform_6, window_bounds = array<i64: 1, 128>}, {pipeline_mode = #tpu.pipeline_mode<synchronous>, transform_indices = @transform_7, window_bounds = array<i64: 1, 1>}, {transform_indices = @transform_8, window_bounds = array<i64: 8, 128>}, {transform_indices = @transform_9, window_bounds = array<i64: 8, 8, 1>}]} {
    %c0 = arith.constant 0 : index
    %c0_0 = arith.constant 0 : index
    %0 = vector.load %arg1[%c0, %c0_0] : memref<8x128xf32, #tpu.memory_space<vmem>>, vector<8x128xf32>
    %c0_1 = arith.constant 0 : index
    %c0_2 = arith.constant 0 : index
    %c0_3 = arith.constant 0 : index
    %1 = vector.load %arg2[%c0_1, %c0_2, %c0_3] : memref<8x8x128xf32, #tpu.memory_space<vmem>>, vector<8x8x128xf32>
    %2 = tpu.transpose %1, [1, 0, 2] : vector<8x8x128xf32> -> vector<8x8x128xf32>
    %c0_4 = arith.constant 0 : index
    %c0_5 = arith.constant 0 : index
    %3 = vector.load %arg3[%c0_4, %c0_5] : memref<128x128xf32, #tpu.memory_space<vmem>>, vector<128x128xf32>
    %cst = arith.constant dense<0.000000e+00> : vector<8x128xf32>
    %4 = tpu.matmul %0, %3, %cst {dimension_numbers = #tpu.dot_dimension_numbers<[1], [0], [0], [1], [0, 0, 1, 1], [], []>} : vector<8x128xf32>, vector<128x128xf32>, vector<8x128xf32> -> vector<8x128xf32>
    %c0_6 = arith.constant 0 : index
    %c0_7 = arith.constant 0 : index
    %5 = vector.load %arg4[%c0_6, %c0_7] : memref<1x128xf32, #tpu.memory_space<vmem>>, vector<1x128xf32>
    %6 = vector.broadcast %5 : vector<1x128xf32> to vector<8x128xf32>
    %7 = arith.addf %4, %6 : vector<8x128xf32>
    %8 = vector.shape_cast %2 : vector<8x8x128xf32> to vector<64x128xf32>
    %c0_8 = arith.constant 0 : index
    %c0_9 = arith.constant 0 : index
    %9 = vector.load %arg5[%c0_8, %c0_9] : memref<128x128xf32, #tpu.memory_space<vmem>>, vector<128x128xf32>
    %cst_10 = arith.constant dense<0.000000e+00> : vector<64x128xf32>
    %10 = tpu.matmul %8, %9, %cst_10 {dimension_numbers = #tpu.dot_dimension_numbers<[1], [0], [0], [1], [0, 0, 1, 1], [], []>} : vector<64x128xf32>, vector<128x128xf32>, vector<64x128xf32> -> vector<64x128xf32>
    %c0_11 = arith.constant 0 : index
    %c0_12 = arith.constant 0 : index
    %11 = vector.load %arg6[%c0_11, %c0_12] : memref<1x128xf32, #tpu.memory_space<vmem>>, vector<1x128xf32>
    %12 = vector.broadcast %11 : vector<1x128xf32> to vector<64x128xf32>
    %13 = arith.addf %10, %12 : vector<64x128xf32>
    %14 = vector.shape_cast %13 : vector<64x128xf32> to vector<8x8x128xf32>
    %15 = vector.shape_cast %7 : vector<8x128xf32> to vector<1x8x128xf32>
    %16 = vector.broadcast %15 : vector<1x8x128xf32> to vector<8x8x128xf32>
    %17 = arith.addf %14, %16 : vector<8x8x128xf32>
    %18 = math.tanh %17 : vector<8x8x128xf32>
    %c0_13 = arith.constant 0 : index
    %c0_14 = arith.constant 0 : index
    %19 = vector.load %arg7[%c0_13, %c0_14] : memref<1x128xf32, #tpu.memory_space<vmem>>, vector<1x128xf32>
    %20 = vector.shape_cast %19 : vector<1x128xf32> to vector<1x1x128xf32>
    %21 = vector.broadcast %20 : vector<1x1x128xf32> to vector<8x8x128xf32>
    %22 = arith.mulf %18, %21 : vector<8x8x128xf32>
    %cst_15 = arith.constant dense<0.000000e+00> : vector<8x8xf32>
    %23 = vector.multi_reduction <add>, %22, %cst_15 [2] : vector<8x8x128xf32> to vector<8x8xf32>
    %24 = vector.shape_cast %23 : vector<8x8xf32> to vector<8x8x1xf32>
    %c0_16 = arith.constant 0 : index
    %c0_17 = arith.constant 0 : index
    %25 = vector.load %arg8[%c0_16, %c0_17] : memref<1x1xf32, #tpu.memory_space<vmem>>, vector<1x1xf32>
    %26 = vector.shape_cast %25 : vector<1x1xf32> to vector<1x1x1xf32>
    %27 = vector.broadcast %26 : vector<1x1x1xf32> to vector<8x8x1xf32>
    %28 = arith.addf %24, %27 : vector<8x8x1xf32>
    %cst_18 = arith.constant dense<0xFF800000> : vector<8x1xf32>
    %29 = vector.multi_reduction <maximumf>, %28, %cst_18 [0] : vector<8x8x1xf32> to vector<8x1xf32>
    %30 = vector.shape_cast %29 : vector<8x1xf32> to vector<1x8x1xf32>
    %31 = vector.broadcast %30 : vector<1x8x1xf32> to vector<8x8x1xf32>
    %32 = arith.subf %28, %31 : vector<8x8x1xf32>
    %33 = math.exp %32 : vector<8x8x1xf32>
    %cst_19 = arith.constant dense<0.000000e+00> : vector<8x1xf32>
    %34 = vector.multi_reduction <add>, %33, %cst_19 [0] : vector<8x8x1xf32> to vector<8x1xf32>
    %35 = vector.shape_cast %34 : vector<8x1xf32> to vector<1x8x1xf32>
    %cst_20 = arith.constant 9.99999993E-9 : f32
    %36 = vector.broadcast %cst_20 : f32 to vector<1x8x1xf32>
    %37 = arith.addf %35, %36 : vector<1x8x1xf32>
    %cst_21 = arith.constant 1.000000e+00 : f32
    %38 = vector.broadcast %cst_21 : f32 to vector<1x8x1xf32>
    %39 = arith.divf %38, %37 : vector<1x8x1xf32>
    %40 = vector.broadcast %39 : vector<1x8x1xf32> to vector<8x8x1xf32>
    %41 = arith.mulf %33, %40 : vector<8x8x1xf32>
    %42 = vector.broadcast %41 : vector<8x8x1xf32> to vector<8x8x128xf32>
    %43 = arith.mulf %2, %42 : vector<8x8x128xf32>
    %cst_22 = arith.constant dense<0.000000e+00> : vector<8x128xf32>
    %44 = vector.multi_reduction <add>, %43, %cst_22 [0] : vector<8x8x128xf32> to vector<8x128xf32>
    %c0_23 = arith.constant 0 : index
    %c0_24 = arith.constant 0 : index
    %45 = vector.load %arg9[%c0_23, %c0_24] : memref<8x128xf32, #tpu.memory_space<vmem>>, vector<8x128xf32>
    tpu.vector_store %arg9[%c0_23, %c0_24], %44 {strides = array<i32>} : memref<8x128xf32, #tpu.memory_space<vmem>>, vector<8x128xf32>,
    %c0_25 = arith.constant 0 : index
    %c0_26 = arith.constant 0 : index
    %c0_27 = arith.constant 0 : index
    %46 = vector.load %arg10[%c0_25, %c0_26, %c0_27] : memref<8x8x1xf32, #tpu.memory_space<vmem>>, vector<8x8x1xf32>
    tpu.vector_store %arg10[%c0_25, %c0_26, %c0_27], %41 {strides = array<i32>} : memref<8x8x1xf32, #tpu.memory_space<vmem>>, vector<8x8x1xf32>,
    return
  }
  func.func @transform_0(%arg0: i32) -> (i32, i32) {
    %c0_i32 = arith.constant 0 : i32
    %c0_i32_0 = arith.constant 0 : i32
    return %arg0, %c0_i32 : i32, i32
  }
  func.func @transform_1(%arg0: i32) -> (i32, i32, i32) {
    %c0_i32 = arith.constant 0 : i32
    %c0_i32_0 = arith.constant 0 : i32
    %c0_i32_1 = arith.constant 0 : i32
    return %arg0, %c0_i32, %c0_i32_0 : i32, i32, i32
  }
  func.func @transform_2(%arg0: i32) -> (i32, i32) {
    %c0_i32 = arith.constant 0 : i32
    %c0_i32_0 = arith.constant 0 : i32
    %c0_i32_1 = arith.constant 0 : i32
    return %c0_i32, %c0_i32_0 : i32, i32
  }
  func.func @transform_3(%arg0: i32) -> (i32, i32) {
    %c0_i32 = arith.constant 0 : i32
    %c0_i32_0 = arith.constant 0 : i32
    %c0_i32_1 = arith.constant 0 : i32
    return %c0_i32, %c0_i32_0 : i32, i32
  }
  func.func @transform_4(%arg0: i32) -> (i32, i32) {
    %c0_i32 = arith.constant 0 : i32
    %c0_i32_0 = arith.constant 0 : i32
    %c0_i32_1 = arith.constant 0 : i32
    return %c0_i32, %c0_i32_0 : i32, i32
  }
  func.func @transform_5(%arg0: i32) -> (i32, i32) {
    %c0_i32 = arith.constant 0 : i32
    %c0_i32_0 = arith.constant 0 : i32
    %c0_i32_1 = arith.constant 0 : i32
    return %c0_i32, %c0_i32_0 : i32, i32
  }
  func.func @transform_6(%arg0: i32) -> (i32, i32) {
    %c0_i32 = arith.constant 0 : i32
    %c0_i32_0 = arith.constant 0 : i32
    %c0_i32_1 = arith.constant 0 : i32
    return %c0_i32, %c0_i32_0 : i32, i32
  }
  func.func @transform_7(%arg0: i32) -> (i32, i32) {
    %c0_i32 = arith.constant 0 : i32
    %c0_i32_0 = arith.constant 0 : i32
    %c0_i32_1 = arith.constant 0 : i32
    return %c0_i32, %c0_i32_0 : i32, i32
  }
  func.func @transform_8(%arg0: i32) -> (i32, i32) {
    %c0_i32 = arith.constant 0 : i32
    %c0_i32_0 = arith.constant 0 : i32
    return %arg0, %c0_i32 : i32, i32
  }
  func.func @transform_9(%arg0: i32) -> (i32, i32, i32) {
    %c0_i32 = arith.constant 0 : i32
    %c0_i32_0 = arith.constant 0 : i32
    %c0_i32_1 = arith.constant 0 : i32
    return %c0_i32, %arg0, %c0_i32_0 : i32, i32, i32
  }
}

</mosaic_0001>

<bundles_post_ra>
// kernel: tpu_custom_call.1
= control target key start
LH: loop header
LB: loop body
LE: loop exit
PB: predicated region body
PF: predicated region fallthrough
CT: control target
= control target key end

     0   :  { %s960_s0 = inlined_call_operand.hbm [shape: f32[8,128], index: 0, kind: input, shape index: {}]   ;;  %s961_s1 = inlined_call_operand.hbm [shape: f32[8,8,128], index: 1, kind: input, shape index: {}]   ;;  %s962_s2 = inlined_call_operand.hbm [shape: f32[128,128], index: 2, kind: input, shape index: {}]   ;;  %s963_s3 = inlined_call_operand.vmem [shape: f32[1,128], index: 3, kind: input, shape index: {}]   ;;  %s964_s4 = inlined_call_operand.hbm [shape: f32[128,128], index: 4, kind: input, shape index: {}]   ;;  %s965_s5 = inlined_call_operand.vmem [shape: f32[1,128], index: 5, kind: input, shape index: {}]   ;;  %s966_s6 = inlined_call_operand.vmem [shape: f32[1,128], index: 6, kind: input, shape index: {}]   ;;  %s967_s7 = inlined_call_operand.<no memory space> [shape: f32[1,1], index: 7, kind: input, shape index: {}]   ;;  %s968_s8 = inlined_call_operand.hbm [shape: f32[8,128], index: 8, kind: output, shape index: {0}]   ;;  %s969_s9 = inlined_call_operand.vmem [shape: f32[8,8,1], index: 9, kind: output, shape index: {1}]  }
   0x1   :  { %v15_v0 = vstv %s967_s7 }
   0x2   :  { %16 = vst [vmem:[#allocation2] sm:$0x1] %v15_v0 }
   0x3   :  { %17 = vsyncpa [#allocation4], 0 }
   0x4   :  { %18 = vsyncpa [#allocation7], 0 }
   0x5   :  { %19 = vsyncpa [#allocation10], 0  ;;  %s36_s13 = sshll.u32 %s961_s1, 4  ;;  %s37_s13 = int_to_ptr.hbm [resolvable:$true] %s36_s13 }
   0x6   :  { %20 = vsyncpa [#allocation5], 0  ;;  %s751_s14 = smov [#allocation6]   ;;  %s26_s18 = sshll.u32 %s960_s0, 4  ;;  %s27_s18 = int_to_ptr.hbm [resolvable:$true] %s26_s18 }
   0x7   :  { %s38_s15 = sshll.u32 %s751_s14, 4  ;;  %s752_s19 = smov 128   ;;  %s39_s15 = int_to_ptr.vmem [resolvable:$true] %s38_s15 }
   0x8   :  { %s753_s20 = smov 8   ;;  %s754_s7 = smov [#allocation3]  }
   0x9   :  { %44 = dma.hbm_to_vmem [thread:$0]  %s37_s13, 1024, %s39_s15, [#allocation7], %s752_s19, %s752_s19, %s753_s20  }
   0xa   :  { %s28_s21 = sshll.u32 %s754_s7, 4  ;;  %s49_s24 = sshll.u32 %s962_s2, 4  ;;  %s29_s21 = int_to_ptr.vmem [resolvable:$true] %s28_s21  ;;  %s50_s24 = int_to_ptr.hbm [resolvable:$true] %s49_s24 }
   0xb   :  { %31 = dma.hbm_to_vmem [thread:$0]  %s27_s18, 128, %s29_s21, [#allocation4]  }
   0xc   :  { %s64_s26 = sshll.u32 %s964_s4, 4  ;;  %s755_s27 = smov [#allocation8]   ;;  %s65_s26 = int_to_ptr.hbm [resolvable:$true] %s64_s26 }
   0xd   :  { %s51_s28 = sshll.u32 %s755_s27, 4  ;;  %s756_s0 = smov [#allocation9]   ;;  %s52_s28 = int_to_ptr.vmem [resolvable:$true] %s51_s28 }
   0xe   :  { %57 = dma.hbm_to_vmem [thread:$0]  %s50_s24, 2048, %s52_s28, [#allocation7], %s752_s19, %s752_s19, %s753_s20  }
   0xf   :  { %s66_s29 = sshll.u32 %s756_s0, 4  ;;  %s67_s29 = int_to_ptr.vmem [resolvable:$true] %s66_s29 }
  0x10   :  { %72 = dma.hbm_to_vmem [thread:$0]  %s65_s26, 2048, %s67_s29, [#allocation10], %s752_s19, %s752_s19, %s753_s20  }
  0x11   :  { %743 = dma.done.wait [#allocation4], 128  }
  0x12   :  { %744 = vsyncadd [#allocation4], 4294967168 }
  0x13   :  { %745 = dma.done.wait [#allocation7], 3072  }
  0x14   :  { %746 = vsyncadd [#allocation7], 4294964224 }
  0x15   :  { %747 = dma.done.wait [#allocation10], 2048  }
  0x16   :  { %748 = vsyncadd [#allocation10], 4294965248  ;;  %v232_v1 = vld [vmem:[#allocation8 + $0x78] sm:$0xff]  ;;  %v231_v3 = vld [vmem:[#allocation8 + $0x70] sm:$0xff]  ;;  %v757_v13 = vmov 1983009808  }
  0x17   :  { %v272_v2 = vld [vmem:[#allocation9 + $0x78] sm:$0xff]  ;;  %237 = vmatpush.msra.mxu0 %v232_v1  ;;  %v271_v4 = vld [vmem:[#allocation9 + $0x70] sm:$0xff]  ;;  %v230_v5 = vld [vmem:[#allocation8 + $0x68] sm:$0xff]  ;;  %v110_v14 = vunpack.c.l.s4 %v757_v13  ;;  %vm105_vm0 = vcmask 1047556   ;;  %v758_v30 = vmov 1934713408  }
  0x18   :  { %277 = vmatpush.msra.mxu1 %v272_v2  ;;  %540 = vmatpush.msra.mxu2 %v272_v2  ;;  %v270_v6 = vld [vmem:[#allocation9 + $0x68] sm:$0xff]  ;;  %v229_v7 = vld [vmem:[#allocation8 + $0x60] sm:$0xff]  ;;  %v228_v9 = vld [vmem:[#allocation8 + $0x58] sm:$0xff]  ;;  %v158_v31 = vunpack.c.l.s4 %v758_v30  ;;  %vm374_vm1 = vcmask 7168   ;;  %s524_s27 = sshll.u32 %s968_s8, 4  ;;  %s525_s27 = int_to_ptr.hbm [resolvable:$true] %s524_s27 }
  0x19   :  { %541 = vmatpush.msra.mxu3 %v272_v2  ;;  %238 = vmatpush.msra.mxu0 %v231_v3  ;;  %v269_v8 = vld [vmem:[#allocation9 + $0x60] sm:$0xff]  ;;  %v268_v10 = vld [vmem:[#allocation9 + $0x58] sm:$0xff]  ;;  %v227_v11 = vld [vmem:[#allocation8 + $0x50] sm:$0xff]  ;;  %v111_v29 = vunpack.c.0.s8 %v110_v14 }
  0x1a   :  { %278 = vmatpush.msra.mxu1 %v271_v4  ;;  %542 = vmatpush.msra.mxu2 %v271_v4  ;;  %v267_v12 = vld [vmem:[#allocation9 + $0x50] sm:$0xff]  ;;  %v226_v15 = vld [vmem:[#allocation8 + $0x48] sm:$0xff]  ;;  %v225_v17 = vld [vmem:[#allocation8 + $0x40] sm:$0xff]  ;;  %v834_v55 = vunpack.c.0.s8 %v158_v31 }
  0x1b   :  { %543 = vmatpush.msra.mxu3 %v271_v4  ;;  %239 = vmatpush.msra.mxu0 %v230_v5  ;;  %v266_v16 = vld [vmem:[#allocation9 + $0x48] sm:$0xff]  ;;  %v265_v18 = vld [vmem:[#allocation9 + $0x40] sm:$0xff]  ;;  %v98_v21 = vld [vmem:[#allocation6 + $0x10] sm:$0xff] }
  0x1c   :  { %279 = vmatpush.msra.mxu1 %v270_v6  ;;  %544 = vmatpush.msra.mxu2 %v270_v6  ;;  %v96_v19 = vld [vmem:[#allocation6] sm:$0xff]  ;;  %v97_v20 = vld [vmem:[#allocation6 + $0x8] sm:$0xff]  ;;  %v224_v22 = vld [vmem:[#allocation8 + $0x38] sm:$0xff]  ;;  %v104_v27 = vrot.slane %v98_v21, 4 }
  0x1d   :  { %545 = vmatpush.msra.mxu3 %v270_v6  ;;  %240 = vmatpush.msra.mxu0 %v229_v7  ;;  %v264_v23 = vld [vmem:[#allocation9 + $0x38] sm:$0xff]  ;;  %v100_v25 = vld [vmem:[#allocation6 + $0x20] sm:$0xff]  ;;  %v101_v26 = vld [vmem:[#allocation6 + $0x28] sm:$0xff]  ;;  %v107_v28 = vrot.slane %v96_v19, 4  ;;  %v119_v35 = vrot.slane %v97_v20, 4 }
  0x1e   :  { %280 = vmatpush.msra.mxu1 %v269_v8  ;;  %546 = vmatpush.msra.mxu2 %v269_v8  ;;  %v99_v24 = vld [vmem:[#allocation6 + $0x18] sm:$0xff]  ;;  %v102_v32 = vld [vmem:[#allocation6 + $0x30] sm:$0xff]  ;;  %v131_v36 = vrot.slane %v100_v25, 4  ;;  %v143_v37 = vrot.slane %v101_v26, 4  ;;  %v106_v38 = vsel %vm105_vm0, %v104_v27, %v96_v19  ;;  %v222_v53 = vld [vmem:[#allocation8 + $0x28] sm:$0xff] }
  0x1f   :  { %547 = vmatpush.msra.mxu3 %v269_v8  ;;  %241 = vmatpush.msra.mxu0 %v228_v9  ;;  %v103_v33 = vld [vmem:[#allocation6 + $0x38] sm:$0xff]  ;;  %v117_v34 = vrot.slane %v99_v24, 4  ;;  %v129_v39 = vrot.slane %v102_v32, 4  ;;  %v108_v41 = vsel %vm105_vm0, %v98_v21, %v107_v28  ;;  %v112_v42 = vperm.slane %v106_v38, %v111_v29  ;;  %v223_v45 = vld [vmem:[#allocation8 + $0x30] sm:$0xff]  ;;  %v262_v54 = vld [vmem:[#allocation9 + $0x28] sm:$0xff] }
  0x20   :  { %281 = vmatpush.msra.mxu1 %v268_v10  ;;  %548 = vmatpush.msra.mxu2 %v268_v10  ;;  %v141_v40 = vrot.slane %v103_v33, 4  ;;  %v829_v44 = vperm.slane %v108_v41, %v111_v29  ;;  %v263_v46 = vld [vmem:[#allocation9 + $0x30] sm:$0xff]  ;;  %v120_v52 = vsel %vm105_vm0, %v99_v24, %v119_v35  ;;  %v132_v57 = vsel %vm105_vm0, %v102_v32, %v131_v36  ;;  %v221_v62 = vld [vmem:[#allocation8 + $0x20] sm:$0xff]  ;;  %v220_v6 = vld [vmem:[#allocation8 + $0x18] sm:$0xff] }
  0x21   :  { %549 = vmatpush.msra.mxu3 %v268_v10  ;;  %242 = vmatpush.msra.mxu0 %v227_v11  ;;  %v118_v43 = vsel %vm105_vm0, %v117_v34, %v97_v20  ;;  %v130_v48 = vsel %vm105_vm0, %v129_v39, %v100_v25  ;;  %v836_v56 = vperm.slane %v120_v52, %v111_v29  ;;  %v261_v63 = vld [vmem:[#allocation9 + $0x20] sm:$0xff]  ;;  %v155_v0 = vrot.slane %v112_v42, 4  ;;  %v260_v7 = vld [vmem:[#allocation9 + $0x18] sm:$0xff]  ;;  %v219_v14 = vld [vmem:[#allocation8 + $0x10] sm:$0xff] }
  0x22   :  { %282 = vmatpush.msra.mxu1 %v267_v12  ;;  %550 = vmatpush.msra.mxu2 %v267_v12  ;;  %v124_v47 = vperm.slane %v118_v43, %v111_v29  ;;  %v142_v49 = vsel %vm105_vm0, %v141_v40, %v101_v26  ;;  %v136_v50 = vperm.slane %v130_v48, %v111_v29  ;;  %v258_v19 = vld [vmem:[#allocation9 + $0x8] sm:$0xff]  ;;  %v217_v27 = vld [vmem:[#allocation8] sm:$0xff]  ;;  %v95_v31 = vld [vmem:[#allocation3] sm:$0xff] }
  0x23   :  { %551 = vmatpush.msra.mxu3 %v267_v12  ;;  %243 = vmatpush.msra.mxu0 %v226_v15  ;;  %v148_v51 = vperm.slane %v142_v49, %v111_v29  ;;  %v144_v58 = vsel %vm105_vm0, %v103_v33, %v143_v37  ;;  %v140_v1 = vperm.slane %v132_v57, %v111_v29  ;;  %v165_v3 = vrot.slane %v836_v56, 4  ;;  %v259_v15 = vld [vmem:[#allocation9 + $0x10] sm:$0xff]  ;;  %v257_v28 = vld [vmem:[#allocation9] sm:$0xff] }
  0x24   :  { %283 = vmatpush.msra.mxu1 %v266_v16  ;;  %552 = vmatpush.msra.mxu2 %v266_v16  ;;  %v153_v59 = vrot.slane %v124_v47, 4  ;;  %v179_v61 = vrot.slane %v136_v50, 4  ;;  %v152_v2 = vperm.slane %v144_v58, %v111_v29  ;;  %v167_v29 = vrot.slane %v829_v44, 4  ;;  %v585_v48 = vld [vmem:[%s963_s3] ss:$0 sm:$0xff] }
  0x25   :  { %553 = vmatpush.msra.mxu3 %v266_v16  ;;  %244 = vmatpush.msra.mxu0 %v225_v17  ;;  %v177_v60 = vrot.slane %v148_v51, 4  ;;  %v166_v9 = vsel %vm105_vm0, %v165_v3, %v829_v44  ;;  %v156_v16 = vsel %vm105_vm0, %v124_v47, %v155_v0  ;;  %v586_v49 = vld [vmem:[%s965_s5] ss:$0 sm:$0xff] }
  0x26   :  { %284 = vmatpush.msra.mxu1 %v265_v18  ;;  %554 = vmatpush.msra.mxu2 %v265_v18  ;;  %v180_v5 = vsel %vm105_vm0, %v148_v51, %v179_v61  ;;  %v189_v10 = vrot.slane %v152_v2, 4  ;;  %v154_v11 = vsel %vm105_vm0, %v153_v59, %v112_v42  ;;  %v172_v13 = vperm.slane %v166_v9, %v834_v55  ;;  %v587_v59 = vld [vmem:[%s966_s6] ss:$0 sm:$0xff] }
  0x27   :  { %555 = vmatpush.msra.mxu3 %v265_v18  ;;  %245 = vmatpush.msra.mxu0 %v224_v22  ;;  %v178_v4 = vsel %vm105_vm0, %v177_v60, %v136_v50  ;;  %v188_v12 = vperm.slane %v180_v5, %v834_v55  ;;  %v218_v18 = vld [vmem:[#allocation8 + $0x8] sm:$0xff]  ;;  %v160_v20 = vperm.slane %v154_v11, %v834_v55  ;;  %v191_v22 = vrot.slane %v140_v1, 4 }
  0x28   :  { %285 = vmatpush.msra.mxu1 %v264_v23  ;;  %556 = vmatpush.msra.mxu2 %v264_v23  ;;  %v184_v8 = vperm.slane %v178_v4, %v834_v55  ;;  %v190_v17 = vsel %vm105_vm0, %v189_v10, %v140_v1  ;;  %v211_v26 = vrot.slane %v172_v13, 4  ;;  %v168_v36 = vsel %vm105_vm0, %v836_v56, %v167_v29 }
  0x29   :  { %557 = vmatpush.msra.mxu3 %v264_v23  ;;  %246 = vmatpush.msra.mxu0 %v223_v45  ;;  %v164_v23 = vperm.slane %v156_v16, %v834_v55  ;;  %v205_v24 = vrot.slane %v188_v12, 4  ;;  %v196_v25 = vperm.slane %v190_v17, %v834_v55  ;;  %v192_v30 = vsel %vm105_vm0, %v152_v2, %v191_v22 }
  0x2a   :  { %286 = vmatpush.msra.mxu1 %v263_v46  ;;  %558 = vmatpush.msra.mxu2 %v263_v46  ;;  %v201_v21 = vrot.slane %v184_v8, 4  ;;  %v200_v35 = vperm.slane %v192_v30, %v834_v55  ;;  %v203_v37 = vrot.slane %v160_v20, 4  ;;  %v176_v39 = vperm.slane %v168_v36, %v834_v55 }
  0x2b   :  { %559 = vmatpush.msra.mxu3 %v263_v46  ;;  %247 = vmatpush.msra.mxu0 %v222_v53  ;;  %v860_v33 = vsel %vm105_vm0, %v205_v24, %v164_v23  ;;  %v863_v34 = vsel %vm105_vm0, %v196_v25, %v211_v26  ;;  %v207_v38 = vrot.slane %v164_v23, 4  ;;  %v209_v44 = vrot.slane %v196_v25, 4 }
  0x2c   :  { %287 = vmatpush.msra.mxu1 %v262_v54  ;;  %560 = vmatpush.msra.mxu2 %v262_v54  ;;  %v857_v32 = vsel %vm105_vm0, %v201_v21, %v160_v20  ;;  %v213_v40 = vrot.slane %v200_v35, 4  ;;  %v873_v41 = vsel %vm105_vm0, %v184_v8, %v203_v37  ;;  %v215_v45 = vrot.slane %v176_v39, 4 }
  0x2d   :  { %561 = vmatpush.msra.mxu3 %v262_v54  ;;  %248 = vmatpush.msra.mxu0 %v221_v62  ;;  %v876_v42 = vsel %vm105_vm0, %v188_v12, %v207_v38  ;;  %v885_v46 = vsel %vm105_vm0, %v209_v44, %v172_v13  ;;  %v759_v36 = vmov 0   ;;  %v588_v38 = vld [vmem:[#allocation2] ss:$0 sm:$0xff] }
  0x2e   :  { %288 = vmatpush.msra.mxu1 %v261_v63  ;;  %562 = vmatpush.msra.mxu2 %v261_v63  ;;  %v879_v43 = vsel %vm105_vm0, %v213_v40, %v176_v39  ;;  %v888_v47 = vsel %vm105_vm0, %v200_v35, %v215_v45 }
  0x2f   :  { %563 = vmatpush.msra.mxu3 %v261_v63  ;;  %249 = vmatpush.msra.mxu0 %v220_v6 }
  0x30   :  { %289 = vmatpush.msra.mxu1 %v260_v7  ;;  %564 = vmatpush.msra.mxu2 %v260_v7 }
  0x31   :  { %565 = vmatpush.msra.mxu3 %v260_v7  ;;  %250 = vmatpush.msra.mxu0 %v219_v14 }
  0x32   :  { %290 = vmatpush.msra.mxu1 %v259_v15  ;;  %566 = vmatpush.msra.mxu2 %v259_v15 }
  0x33   :  { %567 = vmatpush.msra.mxu3 %v259_v15  ;;  %251 = vmatpush.msra.mxu0 %v218_v18 }
  0x34   :  { %291 = vmatpush.msra.mxu1 %v258_v19  ;;  %568 = vmatpush.msra.mxu2 %v258_v19 }
  0x35   :  { %569 = vmatpush.msra.mxu3 %v258_v19  ;;  %252 = vmatpush.msra.mxu0 %v217_v27 }
  0x36   :  { %292 = vmatpush.msra.mxu1 %v257_v28  ;;  %570 = vmatpush.msra.mxu2 %v257_v28 }
  0x37   :  { %571 = vmatpush.msra.mxu3 %v257_v28  ;;  %253 = vmatmul.f32.vlgmr.msra.gmra.mxu0 %v95_v31 }
  0x38   :  { %293 = vmatmul.f32.vlgmr.msra.gmra.mxu1 %v857_v32  ;;  %299 = vmatmul.f32.vlgmr.msra.gmra.mxu2 %v860_v33 }
  0x39   :  { %308 = vmatmul.f32.vlgmr.msra.gmra.mxu3 %v863_v34  ;;  %584 = vset.pattern.permute.xlu1 %v759_v36 }
  0x3a   :  { %583 = vset.pattern.permute.xlu0 %v759_v36  ;;  %582 = vset.pattern.permute.xlu2 %v759_v36 }
  0x40   :  { %296 = vmatmul.f32.gmra.mxu1 %v873_v41  ;;  %302 = vmatmul.f32.gmra.mxu2 %v876_v42 }
  0x41   :  { %311 = vmatmul.f32.gmra.mxu3 %v879_v43 }
  0x48   :  { %305 = vmatmul.f32.gmra.mxu2 %v885_v46 }
  0x49   :  { %314 = vmatmul.f32.gmra.mxu3 %v888_v47 }
  0xb4   :  { %v254_v50 = vpop.f32.mrf.mxu0 }
  0xb5   :  { %v294_v51 = vpop.f32.mrf.mxu1  ;;  %v255_v52 = vadd.f32 %v585_v48, %v254_v50 }
  0xb6   :  { %v295_v53 = vadd.f32 %v586_v49, %v294_v51 }
  0xb8   :  { %v318_v54 = vadd.f32 %v295_v53, %v255_v52 }
  0xba   :  { %589 = vtanh.f32 %v318_v54 }
  0xbb   :  { %v300_v55 = vpop.f32.mrf.mxu2 }
  0xbc   :  { %v309_v56 = vpop.f32.mrf.mxu3  ;;  %v301_v57 = vadd.f32 %v586_v49, %v300_v55 }
  0xbd   :  { %v297_v58 = vpop.f32.mrf.mxu1  ;;  %v310_v16 = vadd.f32 %v586_v49, %v309_v56 }
  0xbe   :  { %v298_v60 = vadd.f32 %v586_v49, %v297_v58  ;;  %v320_v61 = vadd.f32 %v301_v57, %v255_v52 }
  0xbf   :  { %v323_v22 = vadd.f32 %v310_v16, %v255_v52 }
  0xc0   :  { %v590_v62 = vpop.eup %589  ;;  %v319_v63 = vadd.f32 %v298_v60, %v255_v52  ;;  %591 = vtanh.f32 %v320_v61 }
  0xc1   :  { %v338_v0 = vmul.f32 %v590_v62, %v587_v59 }
  0xc2   :  { %593 = vtanh.f32 %v319_v63 }
  0xc3   :  { %346 = vadd.xlane.f32.xlu0 %v338_v0  ;;  %v303_v1 = vpop.f32.mrf.mxu2 }
  0xc4   :  { %v312_v2 = vpop.f32.mrf.mxu3  ;;  %v304_v3 = vadd.f32 %v586_v49, %v303_v1 }
  0xc5   :  { %v313_v4 = vadd.f32 %v586_v49, %v312_v2 }
  0xc6   :  { %v592_v5 = vpop.eup %591  ;;  %v321_v6 = vadd.f32 %v304_v3, %v255_v52 }
  0xc7   :  { %v324_v7 = vadd.f32 %v313_v4, %v255_v52  ;;  %v340_v8 = vmul.f32 %v592_v5, %v587_v59 }
  0xc8   :  { %v594_v9 = vpop.eup %593  ;;  %595 = vtanh.f32 %v321_v6 }
  0xc9   :  { %597 = vtanh.f32 %v324_v7  ;;  %350 = vadd.xlane.f32.xlu1 %v340_v8  ;;  %v339_v10 = vmul.f32 %v594_v9, %v587_v59 }
  0xcb   :  { %v306_v11 = vpop.f32.mrf.mxu2  ;;  %348 = vadd.xlane.f32.xlu0 %v339_v10 }
  0xcc   :  { %v315_v12 = vpop.f32.mrf.mxu3  ;;  %v307_v13 = vadd.f32 %v586_v49, %v306_v11 }
  0xcd   :  { %v316_v14 = vadd.f32 %v586_v49, %v315_v12 }
  0xce   :  { %v596_v15 = vpop.eup %595  ;;  %v322_v17 = vadd.f32 %v307_v13, %v255_v52 }
  0xcf   :  { %v325_v18 = vadd.f32 %v316_v14, %v255_v52  ;;  %v598_v19 = vpop.eup %597  ;;  %v341_v20 = vmul.f32 %v596_v15, %v587_v59 }
  0xd0   :  { %599 = vtanh.f32 %v322_v17  ;;  %v344_v21 = vmul.f32 %v598_v19, %v587_v59 }
  0xd1   :  { %601 = vtanh.f32 %v325_v18  ;;  %352 = vadd.xlane.f32.xlu1 %v341_v20 }
  0xd2   :  { %603 = vtanh.f32 %v323_v22 }
  0xd3   :  { %358 = vadd.xlane.f32.xlu0 %v344_v21 }
  0xd6   :  { %v600_v23 = vpop.eup %599 }
  0xd7   :  { %v602_v24 = vpop.eup %601  ;;  %v342_v25 = vmul.f32 %v600_v23, %v587_v59 }
  0xd8   :  { %v345_v26 = vmul.f32 %v602_v24, %v587_v59  ;;  %v604_v27 = vpop.eup %603 }
  0xd9   :  { %354 = vadd.xlane.f32.xlu2 %v342_v25  ;;  %v343_v28 = vmul.f32 %v604_v27, %v587_v59 }
  0xda   :  { %360 = vadd.xlane.f32.xlu1 %v345_v26 }
  0xe1   :  { %356 = vadd.xlane.f32.xlu2 %v343_v28 }
 0x136   :  { %v347_v29 = vpop.xlane.xlu0 %346 }
 0x137   :  { %v366_v50 = vadd.f32 %v588_v38, %v347_v29 }
 0x139   :  { %v375_v60 = vsel %vm374_vm1, %v366_v50, -inf }
 0x13c   :  { %v351_v30 = vpop.xlane.xlu1 %350 }
 0x13d   :  { %v368_v51 = vadd.f32 %v588_v38, %v351_v30 }
 0x13e   :  { %v349_v31 = vpop.xlane.xlu0 %348 }
 0x13f   :  { %v367_v52 = vadd.f32 %v588_v38, %v349_v31  ;;  %v377_v61 = vsel %vm374_vm1, %v368_v51, -inf }
 0x141   :  { %v376_v62 = vsel %vm374_vm1, %v367_v52, -inf }
 0x144   :  { %v353_v35 = vpop.xlane.xlu1 %352 }
 0x145   :  { %v369_v45 = vadd.f32 %v588_v38, %v353_v35 }
 0x146   :  { %v359_v40 = vpop.xlane.xlu0 %358 }
 0x147   :  { %v372_v48 = vadd.f32 %v588_v38, %v359_v40  ;;  %v378_v55 = vsel %vm374_vm1, %v369_v45, -inf }
 0x149   :  { %v383_v56 = vsel %vm374_vm1, %v372_v48, -inf }
 0x14a   :  { %v384_v0 = vmax.f32 %v377_v61, %v383_v56 }
 0x14c   :  { %v355_v37 = vpop.xlane.xlu2 %354 }
 0x14d   :  { %v361_v39 = vpop.xlane.xlu1 %360  ;;  %v370_v49 = vadd.f32 %v588_v38, %v355_v37 }
 0x14e   :  { %v373_v44 = vadd.f32 %v588_v38, %v361_v39 }
 0x14f   :  { %v379_v57 = vsel %vm374_vm1, %v370_v49, -inf }
 0x150   :  { %v385_v53 = vsel %vm374_vm1, %v373_v44, -inf  ;;  %v380_v1 = vmax.f32 %v375_v60, %v379_v57 }
 0x151   :  { %v386_v59 = vmax.f32 %v378_v55, %v385_v53 }
 0x153   :  { %v388_v3 = vmax.f32 %v384_v0, %v386_v59 }
 0x154   :  { %v357_v54 = vpop.xlane.xlu2 %356 }
 0x155   :  { %v371_v58 = vadd.f32 %v588_v38, %v357_v54 }
 0x157   :  { %v381_v63 = vsel %vm374_vm1, %v371_v58, -inf }
 0x158   :  { %v382_v2 = vmax.f32 %v376_v62, %v381_v63 }
 0x15a   :  { %v387_v4 = vmax.f32 %v380_v1, %v382_v2 }
 0x15c   :  { %v389_v5 = vmax.f32 %v387_v4, %v388_v3 }
 0x15e   :  { %v390_v6 = vsub.f32 %v366_v50, %v389_v5  ;;  %v391_v7 = vsub.f32 %v367_v52, %v389_v5  ;;  %v392_v8 = vsub.f32 %v368_v51, %v389_v5  ;;  %v393_v9 = vsub.f32 %v369_v45, %v389_v5 }
 0x15f   :  { %v394_v10 = vsub.f32 %v370_v49, %v389_v5  ;;  %v395_v14 = vsub.f32 %v371_v58, %v389_v5  ;;  %v396_v16 = vsub.f32 %v372_v48, %v389_v5  ;;  %v397_v19 = vsub.f32 %v373_v44, %v389_v5 }
 0x160   :  { %v398_v11 = vmul.f32 1.442695, %v390_v6  ;;  %v400_v12 = vmul.f32 1.442695, %v391_v7  ;;  %v402_v13 = vmul.f32 1.442695, %v392_v8 }
 0x161   :  { %v404_v15 = vmul.f32 1.442695, %v393_v9  ;;  %v406_v17 = vmul.f32 1.442695, %v394_v10  ;;  %v408_v18 = vmul.f32 1.442695, %v395_v14 }
 0x162   :  { %605 = vpow2.f32 %v398_v11  ;;  %v410_v20 = vmul.f32 1.442695, %v396_v16  ;;  %v412_v23 = vmul.f32 1.442695, %v397_v19 }
 0x163   :  { %607 = vpow2.f32 %v400_v12 }
 0x164   :  { %609 = vpow2.f32 %v402_v13 }
 0x165   :  { %611 = vpow2.f32 %v404_v15 }
 0x166   :  { %613 = vpow2.f32 %v406_v17 }
 0x167   :  { %615 = vpow2.f32 %v408_v18 }
 0x168   :  { %v606_v21 = vpop.eup %605  ;;  %617 = vpow2.f32 %v410_v20 }
 0x169   :  { %v608_v22 = vpop.eup %607  ;;  %v414_v24 = vsel %vm374_vm1, %v606_v21, 0.0  ;;  %619 = vpow2.f32 %v412_v23 }
 0x16a   :  { %v610_v25 = vpop.eup %609  ;;  %v415_v26 = vsel %vm374_vm1, %v608_v22, 0.0 }
 0x16b   :  { %v612_v27 = vpop.eup %611  ;;  %v416_v28 = vadd.f32 %v415_v26, %v414_v24  ;;  %v417_v29 = vsel %vm374_vm1, %v610_v25, 0.0 }
 0x16c   :  { %v614_v30 = vpop.eup %613  ;;  %v419_v35 = vsel %vm374_vm1, %v612_v27, 0.0 }
 0x16d   :  { %v418_v31 = vadd.f32 %v417_v29, %v416_v28  ;;  %v616_v36 = vpop.eup %615  ;;  %v421_v38 = vsel %vm374_vm1, %v614_v30, 0.0 }
 0x16e   :  { %v618_v39 = vpop.eup %617  ;;  %v423_v44 = vsel %vm374_vm1, %v616_v36, 0.0 }
 0x16f   :  { %v420_v37 = vadd.f32 %v419_v35, %v418_v31  ;;  %v620_v45 = vpop.eup %619  ;;  %v425_v49 = vsel %vm374_vm1, %v618_v39, 0.0 }
 0x170   :  { %v427_v51 = vsel %vm374_vm1, %v620_v45, 0.0 }
 0x171   :  { %v422_v40 = vadd.f32 %v421_v38, %v420_v37 }
 0x173   :  { %v424_v48 = vadd.f32 %v423_v44, %v422_v40 }
 0x175   :  { %v426_v50 = vadd.f32 %v425_v49, %v424_v48 }
 0x177   :  { %v428_v52 = vadd.f32 %v427_v51, %v426_v50 }
 0x179   :  { %v429_v53 = vadd.f32 1e-08, %v428_v52 }
 0x17b   :  { %621 = vrcp.f32 %v429_v53  ;;  %v441_v57 = vand.u32 2147483648, %v429_v53  ;;  %v439_v59 = vand.u32 2147483647, %v429_v53  ;;  %vm435_vm3 = vweird.f32 %v429_v53 }
 0x17d   :  { %v442_v61 = vor.u32 1.1754944e-38, %v441_v57  ;;  %vm440_vm5 = vcmp.eq.f32.partialorder %v439_v59, 8.507059e+37 }
 0x181   :  { %v622_v54 = vpop.eup %621 }
 0x182   :  { %v431_v55 = vmul.f32 %v622_v54, %v429_v53  ;;  %vm436_vm2 = vweird.f32 %v622_v54 }
 0x183   :  { %vm437_vm4 = vmor %vm435_vm3, %vm436_vm2 }
 0x184   :  { %v432_v56 = vsub.f32 1.0, %v431_v55 }
 0x186   :  { %v433_v58 = vmul.f32 %v622_v54, %v432_v56 }
 0x188   :  { %v434_v60 = vadd.f32 %v622_v54, %v433_v58 }
 0x18a   :  { %v438_v62 = vsel %vm437_vm4, %v622_v54, %v434_v60 }
 0x18b   :  { %v443_v63 = vsel %vm440_vm5, %v442_v61, %v438_v62 }
 0x18c   :  { %v447_v0 = vmul.f32 %v610_v25, %v443_v63  ;;  %v446_v1 = vmul.f32 %v608_v22, %v443_v63  ;;  %v445_v2 = vmul.f32 %v606_v21, %v443_v63  ;;  %v450_v3 = vmul.f32 %v616_v36, %v443_v63 }
 0x18d   :  { %v448_v4 = vmul.f32 %v612_v27, %v443_v63  ;;  %v452_v5 = vmul.f32 %v620_v45, %v443_v63  ;;  %v449_v6 = vmul.f32 %v614_v30, %v443_v63  ;;  %v451_v7 = vmul.f32 %v618_v39, %v443_v63 }
 0x18e   :  { %465 = vperm.xlu1 %584, %v447_v0   ;;  %511 = vst.msk [vmem:[%s969_s9 + $0x10] sm:$0xff] %vm374_vm1, %v447_v0  ;;  %460 = vperm.xlu0 %583, %v446_v1  }
 0x18f   :  { %510 = vst.msk [vmem:[%s969_s9 + $0x8] sm:$0xff] %vm374_vm1, %v446_v1  ;;  %455 = vperm.xlu2 %582, %v445_v2  }
 0x190   :  { %509 = vst.msk [vmem:[%s969_s9] sm:$0xff] %vm374_vm1, %v445_v2 }
 0x191   :  { %514 = vst.msk [vmem:[%s969_s9 + $0x28] sm:$0xff] %vm374_vm1, %v450_v3 }
 0x192   :  { %512 = vst.msk [vmem:[%s969_s9 + $0x18] sm:$0xff] %vm374_vm1, %v448_v4 }
 0x193   :  { %516 = vst.msk [vmem:[%s969_s9 + $0x38] sm:$0xff] %vm374_vm1, %v452_v5 }
 0x194   :  { %513 = vst.msk [vmem:[%s969_s9 + $0x20] sm:$0xff] %vm374_vm1, %v449_v6 }
 0x195   :  { %515 = vst.msk [vmem:[%s969_s9 + $0x30] sm:$0xff] %vm374_vm1, %v451_v7  ;;  %s760_s9 = smov [#allocation11]  }
 0x196   :  { %480 = vperm.xlu1 %584, %v450_v3   ;;  %s522_s1 = sshll.u32 %s760_s9, 4  ;;  %s523_s1 = int_to_ptr.vmem [resolvable:$true] %s522_s1 }
 0x197   :  { %470 = vperm.xlu2 %582, %v448_v4  }
 0x19e   :  { %490 = vperm.xlu1 %584, %v452_v5  }
 0x19f   :  { %475 = vperm.xlu2 %582, %v449_v6  }
 0x1a7   :  { %485 = vperm.xlu2 %582, %v451_v7  }
 0x1e9   :  { %v456_v8 = vpop.permute.xlu2 %455 }
 0x1ea   :  { %v493_v12 = vmul.f32 %v456_v8, %v857_v32 }
 0x1f1   :  { %v471_v9 = vpop.permute.xlu2 %470 }
 0x1f2   :  { %v496_v17 = vmul.f32 %v471_v9, %v876_v42 }
 0x1f9   :  { %v476_v14 = vpop.permute.xlu2 %475 }
 0x1fa   :  { %v497_v19 = vmul.f32 %v476_v14, %v885_v46 }
 0x200   :  { %v466_v10 = vpop.permute.xlu1 %465  ;;  %v461_v11 = vpop.permute.xlu0 %460 }
 0x201   :  { %v494_v13 = vmul.f32 %v461_v11, %v873_v41  ;;  %v495_v15 = vmul.f32 %v466_v10, %v860_v33  ;;  %v486_v24 = vpop.permute.xlu2 %485 }
 0x202   :  { %v499_v32 = vmul.f32 %v486_v24, %v879_v43 }
 0x203   :  { %v501_v16 = vadd.f32 %v494_v13, %v493_v12 }
 0x205   :  { %v502_v18 = vadd.f32 %v501_v16, %v495_v15 }
 0x207   :  { %v503_v20 = vadd.f32 %v502_v18, %v496_v17 }
 0x208   :  { %v481_v21 = vpop.permute.xlu1 %480 }
 0x209   :  { %v498_v22 = vmul.f32 %v481_v21, %v863_v34  ;;  %v504_v23 = vadd.f32 %v503_v20, %v497_v19 }
 0x20b   :  { %v505_v25 = vadd.f32 %v504_v23, %v498_v22 }
 0x20d   :  { %v506_v41 = vadd.f32 %v505_v25, %v499_v32 }
 0x210   :  { %v491_v26 = vpop.permute.xlu1 %490 }
 0x211   :  { %v500_v33 = vmul.f32 %v491_v26, %v888_v47 }
 0x213   :  { %v507_v42 = vadd.f32 %v506_v41, %v500_v33 }
 0x215   :  { %508 = vst [vmem:[#allocation11] sm:$0xff] %v507_v42 }
 0x216   :  { %527 = dma.vmem_to_hbm [thread:$0]  %s523_s1, 128, %s525_s27, [#allocation5]  }
 0x217   :  { %749 = dma.done.wait [#allocation5], 128  }
 0x218   :  { %750 = vsyncadd [#allocation5], 4294967168 }
 0x219   :  { %536 = vsyncpa [#allocation4], 1 }
 0x21a   :  { %537 = vsyncpa [#allocation7], 1 }
 0x21b   :  { %538 = vsyncpa [#allocation10], 1 }
 0x21c   :  { %539 = vsyncpa [#allocation5], 1 }

</bundles_post_ra>
